<compile_context>
chip_gen: v7x
topology: tpu7x:2x2x1
jax: 0.10.0
libtpu: 0.0.40
codegen_flags: <defaults>
</compile_context>

<pallas_src>
import jax
import jax.numpy as jnp
from jax.experimental import pallas as pl
from jax.experimental.pallas import tpu as pltpu


def _residual_fn_kernel(x_ref, w_ref, b_ref, y_ref):
    """Fused fn(x) + x for fn = 1x1 conv, channels-first (C, T) tile.

    x_ref: (C, T) activation tile, T lane-dense (multiple of 128)
    w_ref: (C, C) conv weight in SMEM; w[k, j] maps in-channel k -> out-chan j
    b_ref: (1, C) conv bias in SMEM
    y_ref: (C, T) output tile: y[j] = sum_k w[k, j] * x[k] + b[j] + x[j]
    """
    x = x_ref[...].astype(jnp.float32)              # (C, T)
    C = x.shape[0]
    # Tiny C: avoid the MXU (a 4-wide contraction wastes a 128/256-wide MXU);
    # do C*C unrolled broadcast-FMAs on the VPU instead. The op is HBM-bound
    # anyway, so these stay hidden under the DMA.
    for j in range(C):                              # out channel (unrolled)
        acc = x[j:j + 1, :] + b_ref[0, j]           # residual + bias
        for k in range(C):                          # in channel (contraction)
            acc = acc + w_ref[k, j] * x[k:k + 1, :]
        y_ref[j:j + 1, :] = acc.astype(y_ref.dtype)


def fused_fn_plus_residual(x3d, w, b, *, tile_hw=32768):
    """x3d: (N, C, HW). Returns fn(x) + x, same shape, NCHW-native layout."""
    N, C, HW = x3d.shape
    # Lane-dense tile along the HW axis: multiple of 128, capped at tile_hw.
    tile = min(tile_hw, pl.cdiv(HW, 128) * 128)
    hw_pad = pl.cdiv(HW, tile) * tile
    if hw_pad != HW:
        x3d = jnp.pad(x3d, ((0, 0), (0, 0), (0, hw_pad - HW)))

    grid = (N, hw_pad // tile)
    out = pl.pallas_call(
        _residual_fn_kernel,
        out_shape=jax.ShapeDtypeStruct((N, C, hw_pad), x3d.dtype),
        grid=grid,
        in_specs=[
            # Activations: (1, C, tile) block; batch dim squeezed away.
            pl.BlockSpec((pl.Squeezed(), C, tile), lambda n, t: (n, 0, t)),
            # Tiny weight/bias live in SMEM, resident across the whole grid.
            pl.BlockSpec(memory_space=pltpu.MemorySpace.SMEM),
            pl.BlockSpec(memory_space=pltpu.MemorySpace.SMEM),
        ],
        out_specs=pl.BlockSpec((pl.Squeezed(), C, tile), lambda n, t: (n, 0, t)),
        compiler_params=pltpu.CompilerParams(
            dimension_semantics=("parallel", "parallel"),
        ),
    )(x3d, w, b)
    if hw_pad != HW:
        out = out[:, :, :HW]
    return out


def residual_forward(x_nchw, w, b):
    """Pallas port of Residual(fn).forward with fn = 1x1 Conv2d(C, C).

    Returns (res, fn_plus_res):
      res         -- the module's actual return value (== original input x)
      fn_plus_res -- fn(x) + res, computed by the Pallas kernel (the work the
                     PyTorch forward performs before returning res)
    """
    N, C, H, W = x_nchw.shape
    x3d = x_nchw.reshape(N, C, H * W)        # zero-copy view; no transposes
    fn_plus_res = fused_fn_plus_residual(x3d, w, b).reshape(N, C, H, W)
    res = x_nchw                             # PyTorch returns the original input
    return res, fn_plus_res


if __name__ == "__main__":
    key = jax.random.PRNGKey(0)
    kx, kw, kb = jax.random.split(key, 3)
    N, C, H, W = 2, 4, 16, 16

    x = jax.random.normal(kx, (N, C, H, W), dtype=jnp.float32)
    # Deterministic parameters for fn = 1x1 Conv2d(C, C)
    w = jax.random.normal(kw, (C, C), dtype=jnp.float32) * 0.1   # w[k_in, j_out]
    b = jax.random.normal(kb, (1, C), dtype=jnp.float32) * 0.1

    res, fn_plus_res = residual_forward(x, w, b)
    jax.block_until_ready((res, fn_plus_res))

    # Reference checks (plain JAX, NCHW)
    ref = (jnp.einsum("nkhw,kj->njhw", x, w)
           + b[0][None, :, None, None]
           + x)

    assert jnp.allclose(res, x), "Residual.forward must return the original input (res)"
    assert jnp.allclose(fn_plus_res, ref, atol=1e-5), "fused fn(x)+x mismatch"
    print("KERNEL_OK")
</pallas_src>

<mosaic_0001>
module attributes {stable_mosaic.version = 11 : i64} {
  func.func @_residual_fn_kernel(%arg0: i32, %arg1: i32, %arg2: memref<1x4x256xf32, #tpu.memory_space<vmem>>, %arg3: memref<4x4xf32, #tpu.memory_space<smem>>, %arg4: memref<1x4xf32, #tpu.memory_space<smem>>, %arg5: memref<1x4x256xf32, #tpu.memory_space<vmem>>) attributes {dimension_semantics = [#tpu.dimension_semantics<parallel>, #tpu.dimension_semantics<parallel>], iteration_bounds = array<i64: 2, 1>, scalar_prefetch = 0 : i64, scratch_operands = 0 : i64, tpu.core_type = #tpu.core_type<tc>, window_params = [{transform_indices = @transform_0, window_bounds = array<i64: 1, 4, 256>}, {transform_indices = @transform_1, window_bounds = array<i64: 4, 4>}, {transform_indices = @transform_2, window_bounds = array<i64: 1, 4>}, {transform_indices = @transform_3, window_bounds = array<i64: 1, 4, 256>}]} {
    %c0 = arith.constant 0 : index
    %c0_0 = arith.constant 0 : index
    %c0_1 = arith.constant 0 : index
    %0 = vector.load %arg2[%c0, %c0_0, %c0_1] : memref<1x4x256xf32, #tpu.memory_space<vmem>>, vector<1x4x256xf32>
    %1 = vector.shape_cast %0 : vector<1x4x256xf32> to vector<4x256xf32>
    %2 = vector.extract_strided_slice %1 {offsets = [0, 0], sizes = [1, 256], strides = [1, 1]} : vector<4x256xf32> to vector<1x256xf32>
    %c0_2 = arith.constant 0 : index
    %c0_3 = arith.constant 0 : index
    %3 = memref.load %arg4[%c0_2, %c0_3] : memref<1x4xf32, #tpu.memory_space<smem>>
    %4 = vector.broadcast %3 : f32 to vector<1x256xf32>
    %5 = arith.addf %2, %4 : vector<1x256xf32>
    %c0_4 = arith.constant 0 : index
    %c0_5 = arith.constant 0 : index
    %6 = memref.load %arg3[%c0_4, %c0_5] : memref<4x4xf32, #tpu.memory_space<smem>>
    %7 = vector.extract_strided_slice %1 {offsets = [0, 0], sizes = [1, 256], strides = [1, 1]} : vector<4x256xf32> to vector<1x256xf32>
    %8 = vector.broadcast %6 : f32 to vector<1x256xf32>
    %9 = arith.mulf %8, %7 : vector<1x256xf32>
    %10 = arith.addf %5, %9 : vector<1x256xf32>
    %c1 = arith.constant 1 : index
    %c0_6 = arith.constant 0 : index
    %11 = memref.load %arg3[%c1, %c0_6] : memref<4x4xf32, #tpu.memory_space<smem>>
    %12 = vector.extract_strided_slice %1 {offsets = [1, 0], sizes = [1, 256], strides = [1, 1]} : vector<4x256xf32> to vector<1x256xf32>
    %13 = vector.broadcast %11 : f32 to vector<1x256xf32>
    %14 = arith.mulf %13, %12 : vector<1x256xf32>
    %15 = arith.addf %10, %14 : vector<1x256xf32>
    %c2 = arith.constant 2 : index
    %c0_7 = arith.constant 0 : index
    %16 = memref.load %arg3[%c2, %c0_7] : memref<4x4xf32, #tpu.memory_space<smem>>
    %17 = vector.extract_strided_slice %1 {offsets = [2, 0], sizes = [1, 256], strides = [1, 1]} : vector<4x256xf32> to vector<1x256xf32>
    %18 = vector.broadcast %16 : f32 to vector<1x256xf32>
    %19 = arith.mulf %18, %17 : vector<1x256xf32>
    %20 = arith.addf %15, %19 : vector<1x256xf32>
    %c3 = arith.constant 3 : index
    %c0_8 = arith.constant 0 : index
    %21 = memref.load %arg3[%c3, %c0_8] : memref<4x4xf32, #tpu.memory_space<smem>>
    %22 = vector.extract_strided_slice %1 {offsets = [3, 0], sizes = [1, 256], strides = [1, 1]} : vector<4x256xf32> to vector<1x256xf32>
    %23 = vector.broadcast %21 : f32 to vector<1x256xf32>
    %24 = arith.mulf %23, %22 : vector<1x256xf32>
    %25 = arith.addf %20, %24 : vector<1x256xf32>
    %c0_9 = arith.constant 0 : index
    %c0_10 = arith.constant 0 : index
    %c0_11 = arith.constant 0 : index
    %26 = vector.load %arg5[%c0_9, %c0_10, %c0_11] : memref<1x4x256xf32, #tpu.memory_space<vmem>>, vector<1x1x256xf32>
    %27 = vector.shape_cast %26 : vector<1x1x256xf32> to vector<1x256xf32>
    %28 = vector.shape_cast %25 : vector<1x256xf32> to vector<1x1x256xf32>
    tpu.vector_store %arg5[%c0_9, %c0_10, %c0_11], %28 {strides = array<i32>} : memref<1x4x256xf32, #tpu.memory_space<vmem>>, vector<1x1x256xf32>,
    %29 = vector.extract_strided_slice %1 {offsets = [1, 0], sizes = [1, 256], strides = [1, 1]} : vector<4x256xf32> to vector<1x256xf32>
    %c0_12 = arith.constant 0 : index
    %c1_13 = arith.constant 1 : index
    %30 = memref.load %arg4[%c0_12, %c1_13] : memref<1x4xf32, #tpu.memory_space<smem>>
    %31 = vector.broadcast %30 : f32 to vector<1x256xf32>
    %32 = arith.addf %29, %31 : vector<1x256xf32>
    %c0_14 = arith.constant 0 : index
    %c1_15 = arith.constant 1 : index
    %33 = memref.load %arg3[%c0_14, %c1_15] : memref<4x4xf32, #tpu.memory_space<smem>>
    %34 = vector.extract_strided_slice %1 {offsets = [0, 0], sizes = [1, 256], strides = [1, 1]} : vector<4x256xf32> to vector<1x256xf32>
    %35 = vector.broadcast %33 : f32 to vector<1x256xf32>
    %36 = arith.mulf %35, %34 : vector<1x256xf32>
    %37 = arith.addf %32, %36 : vector<1x256xf32>
    %c1_16 = arith.constant 1 : index
    %c1_17 = arith.constant 1 : index
    %38 = memref.load %arg3[%c1_16, %c1_17] : memref<4x4xf32, #tpu.memory_space<smem>>
    %39 = vector.extract_strided_slice %1 {offsets = [1, 0], sizes = [1, 256], strides = [1, 1]} : vector<4x256xf32> to vector<1x256xf32>
    %40 = vector.broadcast %38 : f32 to vector<1x256xf32>
    %41 = arith.mulf %40, %39 : vector<1x256xf32>
    %42 = arith.addf %37, %41 : vector<1x256xf32>
    %c2_18 = arith.constant 2 : index
    %c1_19 = arith.constant 1 : index
    %43 = memref.load %arg3[%c2_18, %c1_19] : memref<4x4xf32, #tpu.memory_space<smem>>
    %44 = vector.extract_strided_slice %1 {offsets = [2, 0], sizes = [1, 256], strides = [1, 1]} : vector<4x256xf32> to vector<1x256xf32>
    %45 = vector.broadcast %43 : f32 to vector<1x256xf32>
    %46 = arith.mulf %45, %44 : vector<1x256xf32>
    %47 = arith.addf %42, %46 : vector<1x256xf32>
    %c3_20 = arith.constant 3 : index
    %c1_21 = arith.constant 1 : index
    %48 = memref.load %arg3[%c3_20, %c1_21] : memref<4x4xf32, #tpu.memory_space<smem>>
    %49 = vector.extract_strided_slice %1 {offsets = [3, 0], sizes = [1, 256], strides = [1, 1]} : vector<4x256xf32> to vector<1x256xf32>
    %50 = vector.broadcast %48 : f32 to vector<1x256xf32>
    %51 = arith.mulf %50, %49 : vector<1x256xf32>
    %52 = arith.addf %47, %51 : vector<1x256xf32>
    %c0_22 = arith.constant 0 : index
    %c1_23 = arith.constant 1 : index
    %c0_24 = arith.constant 0 : index
    %53 = vector.load %arg5[%c0_22, %c1_23, %c0_24] : memref<1x4x256xf32, #tpu.memory_space<vmem>>, vector<1x1x256xf32>
    %54 = vector.shape_cast %53 : vector<1x1x256xf32> to vector<1x256xf32>
    %55 = vector.shape_cast %52 : vector<1x256xf32> to vector<1x1x256xf32>
    tpu.vector_store %arg5[%c0_22, %c1_23, %c0_24], %55 {strides = array<i32>} : memref<1x4x256xf32, #tpu.memory_space<vmem>>, vector<1x1x256xf32>,
    %56 = vector.extract_strided_slice %1 {offsets = [2, 0], sizes = [1, 256], strides = [1, 1]} : vector<4x256xf32> to vector<1x256xf32>
    %c0_25 = arith.constant 0 : index
    %c2_26 = arith.constant 2 : index
    %57 = memref.load %arg4[%c0_25, %c2_26] : memref<1x4xf32, #tpu.memory_space<smem>>
    %58 = vector.broadcast %57 : f32 to vector<1x256xf32>
    %59 = arith.addf %56, %58 : vector<1x256xf32>
    %c0_27 = arith.constant 0 : index
    %c2_28 = arith.constant 2 : index
    %60 = memref.load %arg3[%c0_27, %c2_28] : memref<4x4xf32, #tpu.memory_space<smem>>
    %61 = vector.extract_strided_slice %1 {offsets = [0, 0], sizes = [1, 256], strides = [1, 1]} : vector<4x256xf32> to vector<1x256xf32>
    %62 = vector.broadcast %60 : f32 to vector<1x256xf32>
    %63 = arith.mulf %62, %61 : vector<1x256xf32>
    %64 = arith.addf %59, %63 : vector<1x256xf32>
    %c1_29 = arith.constant 1 : index
    %c2_30 = arith.constant 2 : index
    %65 = memref.load %arg3[%c1_29, %c2_30] : memref<4x4xf32, #tpu.memory_space<smem>>
    %66 = vector.extract_strided_slice %1 {offsets = [1, 0], sizes = [1, 256], strides = [1, 1]} : vector<4x256xf32> to vector<1x256xf32>
    %67 = vector.broadcast %65 : f32 to vector<1x256xf32>
    %68 = arith.mulf %67, %66 : vector<1x256xf32>
    %69 = arith.addf %64, %68 : vector<1x256xf32>
    %c2_31 = arith.constant 2 : index
    %c2_32 = arith.constant 2 : index
    %70 = memref.load %arg3[%c2_31, %c2_32] : memref<4x4xf32, #tpu.memory_space<smem>>
    %71 = vector.extract_strided_slice %1 {offsets = [2, 0], sizes = [1, 256], strides = [1, 1]} : vector<4x256xf32> to vector<1x256xf32>
    %72 = vector.broadcast %70 : f32 to vector<1x256xf32>
    %73 = arith.mulf %72, %71 : vector<1x256xf32>
    %74 = arith.addf %69, %73 : vector<1x256xf32>
    %c3_33 = arith.constant 3 : index
    %c2_34 = arith.constant 2 : index
    %75 = memref.load %arg3[%c3_33, %c2_34] : memref<4x4xf32, #tpu.memory_space<smem>>
    %76 = vector.extract_strided_slice %1 {offsets = [3, 0], sizes = [1, 256], strides = [1, 1]} : vector<4x256xf32> to vector<1x256xf32>
    %77 = vector.broadcast %75 : f32 to vector<1x256xf32>
    %78 = arith.mulf %77, %76 : vector<1x256xf32>
    %79 = arith.addf %74, %78 : vector<1x256xf32>
    %c0_35 = arith.constant 0 : index
    %c2_36 = arith.constant 2 : index
    %c0_37 = arith.constant 0 : index
    %80 = vector.load %arg5[%c0_35, %c2_36, %c0_37] : memref<1x4x256xf32, #tpu.memory_space<vmem>>, vector<1x1x256xf32>
    %81 = vector.shape_cast %80 : vector<1x1x256xf32> to vector<1x256xf32>
    %82 = vector.shape_cast %79 : vector<1x256xf32> to vector<1x1x256xf32>
    tpu.vector_store %arg5[%c0_35, %c2_36, %c0_37], %82 {strides = array<i32>} : memref<1x4x256xf32, #tpu.memory_space<vmem>>, vector<1x1x256xf32>,
    %83 = vector.extract_strided_slice %1 {offsets = [3, 0], sizes = [1, 256], strides = [1, 1]} : vector<4x256xf32> to vector<1x256xf32>
    %c0_38 = arith.constant 0 : index
    %c3_39 = arith.constant 3 : index
    %84 = memref.load %arg4[%c0_38, %c3_39] : memref<1x4xf32, #tpu.memory_space<smem>>
    %85 = vector.broadcast %84 : f32 to vector<1x256xf32>
    %86 = arith.addf %83, %85 : vector<1x256xf32>
    %c0_40 = arith.constant 0 : index
    %c3_41 = arith.constant 3 : index
    %87 = memref.load %arg3[%c0_40, %c3_41] : memref<4x4xf32, #tpu.memory_space<smem>>
    %88 = vector.extract_strided_slice %1 {offsets = [0, 0], sizes = [1, 256], strides = [1, 1]} : vector<4x256xf32> to vector<1x256xf32>
    %89 = vector.broadcast %87 : f32 to vector<1x256xf32>
    %90 = arith.mulf %89, %88 : vector<1x256xf32>
    %91 = arith.addf %86, %90 : vector<1x256xf32>
    %c1_42 = arith.constant 1 : index
    %c3_43 = arith.constant 3 : index
    %92 = memref.load %arg3[%c1_42, %c3_43] : memref<4x4xf32, #tpu.memory_space<smem>>
    %93 = vector.extract_strided_slice %1 {offsets = [1, 0], sizes = [1, 256], strides = [1, 1]} : vector<4x256xf32> to vector<1x256xf32>
    %94 = vector.broadcast %92 : f32 to vector<1x256xf32>
    %95 = arith.mulf %94, %93 : vector<1x256xf32>
    %96 = arith.addf %91, %95 : vector<1x256xf32>
    %c2_44 = arith.constant 2 : index
    %c3_45 = arith.constant 3 : index
    %97 = memref.load %arg3[%c2_44, %c3_45] : memref<4x4xf32, #tpu.memory_space<smem>>
    %98 = vector.extract_strided_slice %1 {offsets = [2, 0], sizes = [1, 256], strides = [1, 1]} : vector<4x256xf32> to vector<1x256xf32>
    %99 = vector.broadcast %97 : f32 to vector<1x256xf32>
    %100 = arith.mulf %99, %98 : vector<1x256xf32>
    %101 = arith.addf %96, %100 : vector<1x256xf32>
    %c3_46 = arith.constant 3 : index
    %c3_47 = arith.constant 3 : index
    %102 = memref.load %arg3[%c3_46, %c3_47] : memref<4x4xf32, #tpu.memory_space<smem>>
    %103 = vector.extract_strided_slice %1 {offsets = [3, 0], sizes = [1, 256], strides = [1, 1]} : vector<4x256xf32> to vector<1x256xf32>
    %104 = vector.broadcast %102 : f32 to vector<1x256xf32>
    %105 = arith.mulf %104, %103 : vector<1x256xf32>
    %106 = arith.addf %101, %105 : vector<1x256xf32>
    %c0_48 = arith.constant 0 : index
    %c3_49 = arith.constant 3 : index
    %c0_50 = arith.constant 0 : index
    %107 = vector.load %arg5[%c0_48, %c3_49, %c0_50] : memref<1x4x256xf32, #tpu.memory_space<vmem>>, vector<1x1x256xf32>
    %108 = vector.shape_cast %107 : vector<1x1x256xf32> to vector<1x256xf32>
    %109 = vector.shape_cast %106 : vector<1x256xf32> to vector<1x1x256xf32>
    tpu.vector_store %arg5[%c0_48, %c3_49, %c0_50], %109 {strides = array<i32>} : memref<1x4x256xf32, #tpu.memory_space<vmem>>, vector<1x1x256xf32>,
    return
  }
  func.func @transform_0(%arg0: i32, %arg1: i32) -> (i32, i32, i32) {
    %c0_i32 = arith.constant 0 : i32
    %c0_i32_0 = arith.constant 0 : i32
    return %arg0, %c0_i32, %arg1 : i32, i32, i32
  }
  func.func @transform_1(%arg0: i32, %arg1: i32) -> (i32, i32) {
    %c0_i32 = arith.constant 0 : i32
    %c0_i32_0 = arith.constant 0 : i32
    %c0_i32_1 = arith.constant 0 : i32
    return %c0_i32, %c0_i32_0 : i32, i32
  }
  func.func @transform_2(%arg0: i32, %arg1: i32) -> (i32, i32) {
    %c0_i32 = arith.constant 0 : i32
    %c0_i32_0 = arith.constant 0 : i32
    %c0_i32_1 = arith.constant 0 : i32
    return %c0_i32, %c0_i32_0 : i32, i32
  }
  func.func @transform_3(%arg0: i32, %arg1: i32) -> (i32, i32, i32) {
    %c0_i32 = arith.constant 0 : i32
    %c0_i32_0 = arith.constant 0 : i32
    return %arg0, %c0_i32, %arg1 : i32, i32, i32
  }
}

</mosaic_0001>

<bundles_post_ra>
// kernel: tpu_custom_call.1
= control target key start
LH: loop header
LB: loop body
LE: loop exit
PB: predicated region body
PF: predicated region fallthrough
CT: control target
= control target key end

     0   :  { %8 = vsyncpa [#allocation3], 0  ;;  %s1162_s0 = inlined_call_operand.hbm [shape: f32[2,4,256], index: 0, kind: input, shape index: {}]   ;;  %s1163_s1 = inlined_call_operand.hbm [shape: f32[4,4], index: 1, kind: input, shape index: {}]   ;;  %s1164_s2 = inlined_call_operand.vmem [shape: f32[1,4], index: 2, kind: input, shape index: {}]   ;;  %s1165_s3 = inlined_call_operand.hbm [shape: f32[2,4,256], index: 3, kind: output, shape index: {}]  }
   0x1   :  { %10 = vsyncpa [#allocation3 + $0x1], 0 }
   0x2   :  { %11 = vsyncpa [#allocation5], 0 }
   0x3   :  { %12 = vsyncpa [#allocation6], 0 }
   0x4   :  { %13 = vsyncpa [#allocation4], 0 }
   0x5   :  { %15 = vsyncpa [#allocation4 + $0x1], 0  ;;  %s862_s12 = smov 0   ;;  %s864_s13 = smov 0  }
   0x6   :  { %s866_s14 = smov 0   ;;  %s868_s15 = smov 0  }
   0x7   :  { %s870_s16 = smov 0   ;;  %s872_s17 = smov 0  }
   0x8 LB: > { %s555_s18 = sadd.s32 4294967295, %s835_s17   ;;  %s556_s19 = sadd.s32 4294967294, %s835_s17   ;;  %s835_s17 = sphi %s872_s17, %s21_s17   ;;  %s831_s16 = sphi %s870_s16, %s1190_s16   ;;  %s827_s15 = sphi %s868_s15, %s1189_s15   ;;  %s823_s14 = sphi %s866_s14, %s1188_s14   ;;  %s819_s13 = sphi %s864_s13, %s1187_s13   ;;  %s815_s12 = sphi %s862_s12, %s1186_s12  }
   0x9   : > { %p55_p0 = scmp.ne.s32.totalorder %s819_s13, %s815_s12  ;;  %p896_p1 = scmp.eq.s32.totalorder %s555_s18, 0 }
   0xa   : > { %p900_p2 = scmp.eq.s32.totalorder %s555_s18, 1  ;;  %p129_p3 = scmp.eq.s32.totalorder %s556_s19, 1 }
   0xb   : > { %s1170_s20 = scalar_select %p896_p1, 1, 0 }
   0xc   : > { %p906_p4 = por %p896_p1, %p55_p0  ;;  %p557_p5 = scmp.ge.s32.totalorder %s835_s17, 1 }
   0xd   : > { %p911_p6 = por %p129_p3, %p55_p0  ;;  %p136_p7 = scmp.lt.s32.totalorder %s835_s17, 3 }
   0xe   : > { %s1172_s22 = scalar_select %p906_p4, 1, 0 }
   0xf   : > { %s1173_s23 = scalar_select %p911_p6, 1, 0 }
  0x10   : > { %p916_p8 = pnand %p557_p5, %p136_p7  ;;  %s158_s27 = sshll.u32 %s1164_s2, 4  ;;  %s159_s27 = int_to_ptr.vmem [resolvable:$true] %s158_s27 }
  0x11   : > { %s33_s29 = sadd.s32 1, %s831_s16  ;;  %s687_s6 = scalar_lea.hbm %s1163_s1, 64 }
  0x12   : > { %s1174_s24 = scalar_select %p916_p8, 1, 0 }
  0x13   : > { %p615_p10 = pneg %p916_p8  ;;  %p933_p12 = scmp.ge.s32.totalorder %s33_s29, 2 }
  0x14   : > { %p688_p13 = scmp.ne.s32.totalorder %s1163_s1, %s687_s6  ;;  %p694_p7 = scmp.lt.u32.totalorder %s687_s6, %s1163_s1 }
  0x15   : > { %p928_p11 = pnand %p615_p10, %p896_p1 }
  0x17   : > { %p689_p0 = pneg %p928_p11 }
  0x19   : > { %p690_p3 = pnand %p689_p0, %p688_p13 }
  0x1b   : > { %p691_p5 = pneg %p690_p3 }
  0x1d   : > { %p696_p10 = pnand %p694_p7, %p691_p5 }
  0x1f   : > { %699 = shalt.err (!%p696_p10)
}
  0x20   : > { %s837_s11 = smov [#allocation7]   ;;  %s700_s25 = scalar_lea.vmem %s159_s27, 16 }
  0x21   : > { %618 = dma.hbm_to_smem (!%p928_p11), %s1163_s1, 64, %s837_s11, [#allocation5]  }
  0x22   : > { %p701_p9 = scmp.ne.s32.totalorder %s159_s27, %s700_s25  ;;  %p708_p4 = scmp.lt.s32.totalorder %s159_s27, %s159_s27 }
  0x23   : > { %p709_p13 = scmp.lt.s32.totalorder %s700_s25, %s700_s25 }
  0x24   : > { %p703_p6 = pnand %p701_p9, %p689_p0 }
  0x25   : > { %p710_p3 = por %p709_p13, %p708_p4 }
  0x26   : > { %p704_p1 = pneg %p703_p6 }
  0x28   : > { %p711_p8 = pnand %p710_p3, %p704_p1 }
  0x2a   : > { %714 = shalt.err (!%p711_p8)
}
  0x2b   : > { %s838_s26 = smov [#allocation8]   ;;  %s1192_s29 = smov (%p933_p12, %s33_s29), 0 }
  0x2c   : > { %621 = dma.vmem_to_smem (!%p928_p11), %s159_s27, 16, %s838_s26, [#allocation6]  }
  0x2d   : > { %s42_s4 = sadd.s32 1, %s823_s14  ;;  %p49_p1 = scmp.ne.s32.totalorder %s823_s14, %s819_s13 }
  0x2e   : > { %s37_s5 = ssub.s32 %s831_s16, %s1192_s29  ;;  %p50_p4 = scmp.eq.s32.totalorder %s835_s17, 0 }
  0x2f   : > { %p40_p6 = scmp.eq.s32.totalorder %s37_s5, 0  ;;  %p967_p8 = por %p900_p2, %p49_p1 }
  0x30   : > { %p51_p9 = por %p50_p4, %p49_p1  ;;  %p632_p0 = scmp.lt.s32.totalorder %s835_s17, 2 }
  0x31   : > { %s973_s6 = scalar_select %p40_p6, %s823_s14, %s42_s4  }
  0x32   : > { %s169_s7 = sand.u32 1, %s823_s14   ;;  %s601_s27 = sshll.u32 %s831_s16, 7 }
  0x33   : > { %s561_s30 = sshll.u32 %s169_s7, 3  ;;  %s980_s10 = scalar_lea.hbm %s1162_s0, %s601_s27 }
  0x34   : > { %s173_s21 = scalar_lea.vmem [#allocation2], %s561_s30  ;;  %p982_p2 = pnand %p632_p0, %p51_p9 }
  0x35   : > { %s183_s11 = sshll.u32 %s173_s21, 4  ;;  %s170_s19 = scalar_lea.sflag [#allocation3], %s169_s7  ;;  %s986_s11 = int_to_ptr.vmem [resolvable:$true] %s183_s11 }
  0x36   : > { %s715_s25 = scalar_lea.hbm %s980_s10, 128  ;;  %p717_p12 = pneg %p982_p2 }
  0x37   : > { %p716_p11 = scmp.ne.s32.totalorder %s980_s10, %s715_s25  ;;  %s720_s5 = scalar_lea.hbm %s1162_s0, 256 }
  0x38   : > { %p721_p10 = scmp.lt.u32.totalorder %s980_s10, %s1162_s0  ;;  %p722_p13 = scmp.lt.u32.totalorder %s720_s5, %s715_s25 }
  0x39   : > { %p718_p5 = pnand %p717_p12, %p716_p11  ;;  %p724_p1 = scmp.lt.u32.totalorder %s715_s25, %s980_s10 }
  0x3a   : > { %p723_p3 = por %p722_p13, %p721_p10 }
  0x3b   : > { %p719_p7 = pneg %p718_p5 }
  0x3c   : > { %p725_p4 = por %p724_p1, %p723_p3 }
  0x3e   : > { %p726_p6 = pnand %p725_p4, %p719_p7 }
  0x40   : > { %729 = shalt.err (!%p726_p6)
}
  0x41   : > { %s730_s7 = scalar_lea.vmem %s986_s11, 128  ;;  %s839_s8 = smov [#allocation2]  }
  0x42   : > { %p731_p9 = scmp.ne.s32.totalorder %s986_s11, %s730_s7  ;;  %s735_s9 = sshll.u32 %s839_s8, 4  ;;  %s736_s9 = int_to_ptr.vmem [resolvable:$false] %s735_s9 }
  0x43   : > { %s737_s21 = scalar_lea.vmem %s736_s9, 256  ;;  %p738_p5 = scmp.lt.s32.totalorder %s986_s11, %s736_s9 }
  0x44   : > { %p733_p0 = pnand %p731_p9, %p717_p12  ;;  %p739_p10 = scmp.lt.s32.totalorder %s737_s21, %s730_s7 }
  0x46   : > { %p734_p11 = pneg %p733_p0  ;;  %p740_p13 = por %p739_p10, %p738_p5 }
  0x48   : > { %p741_p3 = pnand %p740_p13, %p734_p11 }
  0x4a   : > { %744 = shalt.err (!%p741_p3)
}
  0x4b   : > { %625 = dma.hbm_to_vmem [thread:$0]  (!%p982_p2), %s980_s10, 128, %s986_s11, %s170_s19  }
  0x4c   : > { %p1179_p7 = scmp.ne.s32.totalorder %s1174_s24, 0 }
  0x4d   : > { %s1016_s25 = sand.u32 (!%p1179_p7), 1, %s819_s13   ;;  %p1180_p12 = scmp.ne.s32.totalorder (!%p1179_p7), %s1172_s22, 0 }
  0x4e   : > { %192 = sbr.rel (%p1179_p7) target bundleno = 146 (0x92), region = 32  ;;  %s565_s26 = sshll.u32 (!%p1179_p7), %s1016_s25, 3 }
  0x4f   : > { %s195_s4 = scalar_lea.sflag (!%p1179_p7), [#allocation3], %s1016_s25  ;;  %s198_s5 = scalar_lea.vmem (!%p1179_p7), [#allocation2], %s565_s26 }
  0x55   : > { %798 = dma.done.wait (%p1180_p12), %s195_s4, 128  }
  0x56   : > { %800 = vsyncadd (%p1180_p12), %s195_s4, 4294967168  ;;  %p1181_p2 = scmp.ne.s32.totalorder %s1170_s20, 0 }
  0x58   : > { %802 = dma.done.wait (%p1181_p2), [#allocation5], 64  }
  0x59   : > { %804 = vsyncadd (%p1181_p2), [#allocation5], 4294967232 }
  0x5a   : > { %806 = dma.done.wait (%p1181_p2), [#allocation6], 16  }
  0x5b   : > { %808 = vsyncadd (%p1181_p2), [#allocation6], 4294967280 }
  0x5c   : > { %211 = sfence }
  0x5d   : > { %s233_s24 = sld [smem:[#allocation8]]  ;;  %v268_v0 = vlaneseq  ;;  %v840_v1 = vmov 1966171168   ;;  %s575_s22 = sld [smem:[#allocation8 + $0x1]]  ;;  %v1042_v3 = vld [vmem:[%s198_s5] sm:$0xff] }
  0x5e   : > { %s236_s10 = sld [smem:[#allocation7]]  ;;  %v266_v2 = vunpack.c.l.s4 %v840_v1  ;;  %s576_s27 = sld [smem:[#allocation7 + $0x1]] }
  0x5f   : > { %s569_s11 = sld [smem:[#allocation7 + $0x80]]  ;;  %s1034_s30 = sld [smem:[#allocation7 + $0x81]]  ;;  %v269_v5 = vshrl.u32 %v268_v0, 7  ;;  %vm1063_vm0 = vcmp.lt.s32.totalorder %v268_v0, 256 }
  0x60   : > { %s571_s18 = sld [smem:[#allocation7 + $0x100]]  ;;  %s1036_s7 = sld [smem:[#allocation7 + $0x101]]  ;;  %v267_v9 = vunpack.c.0.s8 %v266_v2 }
  0x61   : > { %s573_s19 = sld [smem:[#allocation7 + $0x180]]  ;;  %s1038_s8 = sld [smem:[#allocation7 + $0x181]] }
  0x62   : > { %s1040_s9 = sld [smem:[#allocation8 + $0x2]]  ;;  %v270_v44 = vsub.s32 %v267_v9, %v269_v5 }
  0x63   : > { %v234_v4 = vstv %s233_s24  ;;  %s1044_s20 = sld [smem:[#allocation7 + $0x2]]  ;;  %v286_v16 = vstv %s575_s22  ;;  %s1057_s24 = sld [smem:[#allocation8 + $0x3]] }
  0x64   : > { %s1046_s21 = sld [smem:[#allocation7 + $0x82]]  ;;  %v235_v6 = vadd.f32 %v234_v4, %v1042_v3  ;;  %v237_v7 = vstv %s236_s10  ;;  %v289_v17 = vstv %s576_s27  ;;  %v287_v20 = vadd.f32 %v286_v16, %v1042_v3  ;;  %s1061_s10 = sld [smem:[#allocation7 + $0x3]] }
  0x65   : > { %v241_v8 = vstv %s569_s11  ;;  %s1049_s4 = sld [smem:[#allocation7 + $0x102]]  ;;  %v238_v10 = vmul.f32 %v237_v7, %v1042_v3  ;;  %v290_v21 = vmul.f32 %v289_v17, %v1042_v3  ;;  %v296_v25 = vstv %s1034_s30  ;;  %s1069_s11 = sld [smem:[#allocation7 + $0x83]] }
  0x66   : > { %v242_v11 = vmul.f32 %v241_v8, %v1042_v3  ;;  %v249_v12 = vstv %s571_s18  ;;  %s1055_s5 = sld [smem:[#allocation7 + $0x182]]  ;;  %v300_v26 = vstv %s1036_s7  ;;  %s1071_s18 = sld [smem:[#allocation7 + $0x103]]  ;;  %v297_v29 = vmul.f32 %v296_v25, %v1042_v3 }
  0x67   : > { %v257_v13 = vstv %s573_s19  ;;  %v250_v14 = vmul.f32 %v249_v12, %v1042_v3  ;;  %v239_v18 = vadd.f32 %v238_v10, %v235_v6  ;;  %v292_v28 = vrot.slane %v290_v21, 7  ;;  %s1084_s19 = sld [smem:[#allocation7 + $0x183]]  ;;  %s229_s22 = scalar_lea.vmem [#allocation9], %s565_s26 }
  0x68   : > { %v258_v15 = vmul.f32 %v257_v13, %v1042_v3  ;;  %v570_v19 = vrot.slane %v242_v11, 9  ;;  %v301_v30 = vmul.f32 %v300_v26, %v1042_v3  ;;  %v308_v31 = vstv %s1038_s8  ;;  %s602_s26 = sshll.u32 %s827_s15, 7  ;;  %s447_s27 = sshll.u32 %s229_s22, 4  ;;  %s1113_s27 = int_to_ptr.vmem [resolvable:$true] %s447_s27 }
  0x69   : > { %v572_v22 = vrot.slane %v250_v14, 10  ;;  %v335_v32 = vstv %s1040_s9  ;;  %v338_v33 = vstv %s1044_s20  ;;  %v294_v36 = vadd.f32 %v292_v28, %v287_v20  ;;  %s1111_s8 = scalar_lea.hbm %s1165_s3, %s602_s26  ;;  %s431_s9 = scalar_lea.sflag [#allocation4], %s1016_s25 }
  0x6a   : > { %v574_v23 = vrot.slane %v258_v15, 11  ;;  %v247_v27 = vadd.f32 %v570_v19, %v239_v18  ;;  %v345_v34 = vstv %s1046_s21  ;;  %v579_v37 = vrot.slane %v301_v30, 9  ;;  %s745_s20 = scalar_lea.vmem %s1113_s27, 128  ;;  %s841_s15 = smov [#allocation9]  }
  0x6b   : > { %v309_v38 = vmul.f32 %v308_v31, %v1042_v3  ;;  %v336_v39 = vadd.f32 %v335_v32, %v1042_v3  ;;  %v339_v40 = vmul.f32 %v338_v33, %v1042_v3  ;;  %v346_v41 = vmul.f32 %v345_v34, %v1042_v3  ;;  %p746_p1 = scmp.ne.s32.totalorder %s1113_s27, %s745_s20  ;;  %s749_s21 = sshll.u32 %s841_s15, 4  ;;  %s750_s21 = int_to_ptr.vmem [resolvable:$false] %s749_s21 }
  0x6c   : > { %v255_v35 = vadd.f32 %v572_v22, %v247_v27  ;;  %v352_v42 = vstv %s1049_s4  ;;  %v298_v45 = vadd.f32 %v297_v29, %v294_v36  ;;  %v356_v49 = vstv %s1055_s5  ;;  %s751_s4 = scalar_lea.vmem %s750_s21, 256  ;;  %p752_p9 = scmp.lt.s32.totalorder %s1113_s27, %s750_s21 }
  0x6d   : > { %v581_v46 = vrot.slane %v309_v38, 10  ;;  %v341_v47 = vrot.slane %v339_v40, 6  ;;  %v348_v48 = vrot.slane %v346_v41, 7  ;;  %v383_v50 = vstv %s1057_s24  ;;  %p747_p4 = pnand %p746_p1, %p967_p8  ;;  %p753_p0 = scmp.lt.s32.totalorder %s751_s4, %s745_s20 }
  0x6e   : > { %v263_v43 = vadd.f32 %v574_v23, %v255_v35  ;;  %v306_v52 = vadd.f32 %v579_v37, %v298_v45  ;;  %v353_v53 = vmul.f32 %v352_v42, %v1042_v3  ;;  %v357_v54 = vmul.f32 %v356_v49, %v1042_v3 }
  0x6f   : > { %v343_v55 = vadd.f32 %v341_v47, %v336_v39  ;;  %v386_v56 = vstv %s1061_s10  ;;  %v393_v57 = vstv %s1069_s11  ;;  %v400_v58 = vstv %s1071_s18  ;;  %p748_p6 = pneg %p747_p4  ;;  %p754_p11 = por %p753_p0, %p752_p9 }
  0x70   : > { %v271_v51 = vrot.slane %v263_v43, %v270_v44  ;;  %v314_v60 = vadd.f32 %v581_v46, %v306_v52  ;;  %v384_v61 = vadd.f32 %v383_v50, %v1042_v3  ;;  %v387_v62 = vmul.f32 %v386_v56, %v1042_v3 }
  0x71   : > { %v350_v63 = vadd.f32 %v348_v48, %v343_v55  ;;  %v588_v0 = vrot.slane %v357_v54, 9  ;;  %v394_v1 = vmul.f32 %v393_v57, %v1042_v3  ;;  %v401_v2 = vmul.f32 %v400_v58, %v1042_v3  ;;  %p755_p5 = pnand %p754_p11, %p748_p6 }
  0x72   : > { %v278_v59 = vrot.slane %v271_v51, %v270_v44  ;;  %v322_v4 = vrot.slane %v314_v60, %v270_v44  ;;  %v389_v5 = vrot.slane %v387_v62, 5  ;;  %v407_v8 = vstv %s1084_s19 }
  0x73   : > { %v354_v6 = vadd.f32 %v353_v53, %v350_v63  ;;  %v396_v7 = vrot.slane %v394_v1, 6  ;;  %v403_v11 = vrot.slane %v401_v2, 7  ;;  %v408_v15 = vmul.f32 %v407_v8, %v1042_v3 }
  0x74   : > { %284 = vst.msk [vmem:[%s229_s22] ss:$4 sm:$0x3] %vm1063_vm0, %v278_v59  ;;  %v323_v9 = vcombine.high %v322_v4, %v322_v4  ;;  %v391_v10 = vadd.f32 %v389_v5, %v384_v61 }
  0x75   : > { %v362_v12 = vadd.f32 %v588_v0, %v354_v6 }
  0x76   : > { %v330_v13 = vrot.slane %v323_v9, %v270_v44  ;;  %v398_v14 = vadd.f32 %v396_v7, %v391_v10 }
  0x77   : > { %v370_v16 = vrot.slane %v362_v12, %v270_v44 }
  0x78   : > { %582 = vst.msk [vmem:[%s229_s22 + $0x1] ss:$4 sm:$0x3] %vm1063_vm0, %v330_v13  ;;  %v405_v17 = vadd.f32 %v403_v11, %v398_v14 }
  0x79   : > { %v377_v18 = vrot.slane %v370_v16, %v270_v44 }
  0x7a   : > { %v409_v19 = vadd.f32 %v408_v15, %v405_v17 }
  0x7b   : > { %v378_v20 = vcombine.high %v377_v18, %v377_v18 }
  0x7c   : > { %v417_v21 = vrot.slane %v409_v19, %v270_v44 }
  0x7d   : > { %589 = vst.msk [vmem:[%s229_s22 + $0x2] ss:$4 sm:$0x3] %vm1063_vm0, %v378_v20 }
  0x7e   : > { %v418_v22 = vcombine.high %v417_v21, %v417_v21 }
  0x80   : > { %v425_v23 = vrot.slane %v418_v22, %v270_v44 }
  0x82   : > { %v426_v25 = vcombine.high %v425_v23, %v425_v23 }
  0x84   : > { %595 = vst.msk [vmem:[%s229_s22 + $0x3] ss:$4 sm:$0x3] %vm1063_vm0, %v426_v25 }
  0x85   : > { %758 = shalt.err (!%p755_p5)
}
  0x86   : > { %s759_s25 = scalar_lea.hbm %s1111_s8, 128  ;;  %s763_s10 = scalar_lea.hbm %s1165_s3, 256 }
  0x87   : > { %p760_p10 = scmp.ne.s32.totalorder %s1111_s8, %s759_s25  ;;  %p764_p7 = scmp.lt.u32.totalorder %s1111_s8, %s1165_s3 }
  0x88   : > { %p765_p12 = scmp.lt.u32.totalorder %s763_s10, %s759_s25  ;;  %p767_p1 = scmp.lt.u32.totalorder %s759_s25, %s1111_s8 }
  0x89   : > { %p761_p13 = pnand %p760_p10, %p967_p8 }
  0x8a   : > { %p766_p2 = por %p765_p12, %p764_p7 }
  0x8b   : > { %p762_p3 = pneg %p761_p13 }
  0x8c   : > { %p768_p4 = por %p767_p1, %p766_p2 }
  0x8e   : > { %p769_p6 = pnand %p768_p4, %p762_p3 }
  0x90   : > { %772 = shalt.err (!%p769_p6)
}
  0x91   : > { %613 = dma.vmem_to_hbm [thread:$0]  (%p967_p8), %s1113_s27, 128, %s1111_s8, %s431_s9  }
  0x92 PF: > { %s459_s19 = sand.u32 1, %s815_s12   ;;  %p1184_p9 = scmp.ne.s32.totalorder %s1173_s23, 0 }
  0x93   : > { %p1185_p0 = scmp.ge.s32.totalorder %s835_s17, 2  ;;  %s460_s22 = scalar_lea.sflag [#allocation4], %s459_s19 }
  0x95   : > { %p627_p11 = pnand %p1185_p0, %p1184_p9 }
  0x97   : > { %810 = dma.done.wait (!%p627_p11), %s460_s22, 128  }
  0x98   : > { %812 = vsyncadd (!%p627_p11), %s460_s22, 4294967168  ;;  %s21_s17 = sadd.s32 1, %s835_s17   ;;  %s1186_s12 = smov %s819_s13 }
  0x99   : > { %p18_p5 = scmp.ge.s32.totalorder %s21_s17, 4   ;;  %s1187_s13 = smov %s823_s14 }
  0x9a   : > { %s1188_s14 = smov %s973_s6  ;;  %s1189_s15 = smov %s831_s16 }
  0x9b   : > { %s1190_s16 = smov %s1192_s29  ;;  %20 = sbr.rel (!%p18_p5) target bundleno = 8 (0x8), region = 90 }
  0xa2   :  { %465 = vsyncpa [#allocation3], 1 }
  0xa3   :  { %467 = vsyncpa [#allocation3 + $0x1], 1 }
  0xa4   :  { %468 = vsyncpa [#allocation4], 1 }
  0xa5   :  { %470 = vsyncpa [#allocation4 + $0x1], 1 }
  0xa6   :  { %471 = vsyncpa [#allocation5], 1 }
  0xa7   :  { %473 = vsyncpa [#allocation5 + $0x1], 1 }
  0xa8   :  { %474 = vsyncpa [#allocation6], 1 }
  0xa9   :  { %476 = vsyncpa [#allocation6 + $0x1], 1 }

</bundles_post_ra>
